<compile_context>
chip_gen: v7x
topology: tpu7x:2x2x1
jax: 0.10.0
libtpu: 0.0.40
codegen_flags: <defaults>
</compile_context>

<pallas_src>
import math
import functools

import jax
import jax.numpy as jnp
from jax import lax
from jax.experimental import pallas as pl
from jax.experimental.pallas import tpu as pltpu


# ----------------------------------------------------------------------------
# Kernels
# ----------------------------------------------------------------------------
def _qkv_proj_kernel(x_ref, w_ref, b_ref, o_ref, acc_ref, *, compute_dtype):
    """Grid step = (projection*head ph, batch b, row tile i, K tile k).

    Computes a (tm, Dh) tile of the head-split q/k/v projection and writes it
    straight into (3*H, B, S, Dh) layout.  f32 accumulation in VMEM scratch.
    """
    k = pl.program_id(3)

    @pl.when(k == 0)
    def _():
        acc_ref[...] = jnp.zeros_like(acc_ref)

    # Cast the activation tile in-kernel (VPU op hidden under the matmul),
    # instead of a separate HBM-roundtrip cast pass in the wrapper.
    x_tile = x_ref[0].astype(compute_dtype)                       # (tm, tk)
    acc_ref[...] += jnp.dot(x_tile, w_ref[0],
                            preferred_element_type=jnp.float32)   # (tm, Dh)

    @pl.when(k == pl.num_programs(3) - 1)
    def _():
        o_ref[0, 0] = (acc_ref[...] + b_ref[0]).astype(o_ref.dtype)


def _flash_attn_kernel(q_ref, k_ref, v_ref, o_ref, m_sc, l_sc, acc_sc, *,
                       tq, tkv, causal, compute_dtype, approx_recip):
    """Grid step = (batch, head, q tile, kv tile); online softmax over kv."""
    qi = pl.program_id(2)
    kj = pl.program_id(3)

    @pl.when(kj == 0)
    def _():
        m_sc[...] = jnp.full_like(m_sc, -jnp.inf)
        l_sc[...] = jnp.zeros_like(l_sc)
        acc_sc[...] = jnp.zeros_like(acc_sc)

    def step():
        q = q_ref[0, 0]                                           # (tq, Dh)
        kt = k_ref[0, 0]                                          # (tkv, Dh)
        v = v_ref[0, 0]                                           # (tkv, Dh)
        # q @ k^T with contraction on the last dim of both operands (no
        # explicit transpose).  1/sqrt(d_head) is pre-folded into q's weights.
        s = lax.dot_general(q, kt, (((1,), (1,)), ((), ())),
                            preferred_element_type=jnp.float32)   # (tq, tkv)
        if causal:
            row = qi * tq + lax.broadcasted_iota(jnp.int32, (tq, tkv), 0)
            col = kj * tkv + lax.broadcasted_iota(jnp.int32, (tq, tkv), 1)
            s = jnp.where(col > row, -jnp.inf, s)                 # triu(1) mask

        m_prev = m_sc[...]
        m_new = jnp.maximum(m_prev, jnp.max(s, axis=-1, keepdims=True))
        alpha = jnp.exp(m_prev - m_new)
        p = jnp.exp(s - m_new)
        l_sc[...] = alpha * l_sc[...] + jnp.sum(p, axis=-1, keepdims=True)
        acc_sc[...] = alpha * acc_sc[...] + jnp.dot(
            p.astype(compute_dtype), v, preferred_element_type=jnp.float32)
        m_sc[...] = m_new

    if causal:
        # Skip kv tiles lying entirely above the diagonal (fully masked):
        # ~2x less QK^T / PV / exp work for causal attention.
        @pl.when(kj * tkv <= qi * tq + (tq - 1))
        def _():
            step()
    else:
        step()

    @pl.when(kj == pl.num_programs(3) - 1)
    def _():
        inv_l = pl.reciprocal(l_sc[...], approx=approx_recip)     # EUP slot
        o_ref[0, 0] = (acc_sc[...] * inv_l).astype(o_ref.dtype)


def _matmul_bias_kernel(x_ref, w_ref, b_ref, o_ref, acc_ref, *, compute_dtype):
    """Standard lane-dense tiled (M,K)@(K,N) + b, used for out_proj."""
    k = pl.program_id(2)

    @pl.when(k == 0)
    def _():
        acc_ref[...] = jnp.zeros_like(acc_ref)

    acc_ref[...] += jnp.dot(x_ref[...].astype(compute_dtype), w_ref[...],
                            preferred_element_type=jnp.float32)

    @pl.when(k == pl.num_programs(2) - 1)
    def _():
        o_ref[...] = (acc_ref[...] + b_ref[...]).astype(o_ref.dtype)


# ----------------------------------------------------------------------------
# Parameter preparation (init-time, NOT per forward call)
# ----------------------------------------------------------------------------
def prepare_self_attention_params(w_in, b_in, w_out, b_out, n_heads,
                                  compute_dtype=jnp.bfloat16):
    """Torch layout in: w_in (3D, D), b_in (3D,), w_out (D, D), b_out (D,).

    * Folds 1/sqrt(d_head) into the q projection (weights + bias).
    * Reshapes/transposes W_in to per-(projection, head) (3H, D, Dh) so the
      in_proj kernel emits q/k/v already head-split (no relayout downstream).
    * Casts matmul weights to `compute_dtype` (default bf16 — MXU-native on
      v5e/v6e/v7x); biases stay f32 (added after f32 accumulation).
    """
    w_in = jnp.asarray(w_in, jnp.float32)
    b_in = jnp.asarray(b_in, jnp.float32)
    w_out = jnp.asarray(w_out, jnp.float32)
    b_out = jnp.asarray(b_out, jnp.float32)

    D = w_out.shape[0]
    H = int(n_heads)
    assert D % H == 0, "d_embd must be divisible by n_heads"
    Dh = D // H

    # Fold the softmax scale into the q rows (reference masks with -inf before
    # scaling; -inf is unchanged by the positive scale, so this is exact).
    scale = jnp.concatenate([jnp.full((D,), 1.0 / math.sqrt(Dh), jnp.float32),
                             jnp.ones((2 * D,), jnp.float32)])
    w_in_s = w_in * scale[:, None]
    b_in_s = b_in * scale

    w_qkv = (w_in_s.reshape(3 * H, Dh, D)        # row p*D + h*Dh + d
             .transpose(0, 2, 1)                  # -> (3H, D, Dh)  (x @ W^T form)
             .astype(compute_dtype))
    b_qkv = b_in_s.reshape(3 * H, 1, Dh)          # f32

    return dict(
        w_qkv=w_qkv,
        b_qkv=b_qkv,
        w_out_t=w_out.T.astype(compute_dtype),    # (D, D)
        b_out=b_out.reshape(1, D),                # f32
        n_heads=H,
        d_head=Dh,
        compute_dtype=compute_dtype,
    )


# ----------------------------------------------------------------------------
# Tile / VMEM heuristics (generation-aware)
# ----------------------------------------------------------------------------
def _tpu_vmem_capacity_bytes():
    """v5e/v6e: 128 MiB, v7x: 64 MiB; conservative fallback if query fails."""
    try:
        return int(pltpu.get_tpu_info().vmem_capacity_bytes)
    except Exception:
        return 64 * 1024 * 1024


def _pick_tile(dim, target, base):
    """Largest multiple of `base` dividing `dim` that is <= target, else the
    full extent (a full-extent block is always layout-legal)."""
    if dim <= target:
        return dim
    t = (target // base) * base
    while t >= base:
        if dim % t == 0:
            return t
        t -= base
    return dim


# ----------------------------------------------------------------------------
# Forward
# ----------------------------------------------------------------------------
def self_attention_pallas(x, params, causal_mask=False,
                          approx_softmax_recip=True):
    """x: (B, S, D) f32; params: output of prepare_self_attention_params."""
    B, S, D = x.shape
    H = params["n_heads"]
    Dh = params["d_head"]
    cdt = params["compute_dtype"]
    assert H * Dh == D

    vmem_cap = _tpu_vmem_capacity_bytes()
    big_vmem = vmem_cap >= 96 * 1024 * 1024
    # Headroom below physical capacity: ~48 MiB on v7x, ~96 MiB on v5e/v6e.
    vmem_limit = int(max(min(vmem_cap * 3 // 4, 112 * 1024 * 1024),
                         32 * 1024 * 1024))

    # Tiles: MXU-friendly multiples of 256 (v6e/v7x granule; 128 divides them
    # for v5e); larger on 128-MiB-VMEM parts.  Per-step working sets stay in
    # the low-MiB range, far under the limit.
    tm_in = _pick_tile(S, 512 if big_vmem else 256, 8)
    tk_in = _pick_tile(D, 512, 128)

    tq = _pick_tile(S, 512 if big_vmem else 256, 128)
    tkv = _pick_tile(S, 512 if big_vmem else 256, 128)

    M = B * S
    tm_o = _pick_tile(M, 512 if big_vmem else 256, 8)
    tn_o = _pick_tile(D, 256, 128)
    tk_o = _pick_tile(D, 512, 128)

    # ---- Stage 1: in_proj -> head-split qkv (3H, B, S, Dh), compute dtype ---
    qkvh = pl.pallas_call(
        functools.partial(_qkv_proj_kernel, compute_dtype=cdt),
        out_shape=jax.ShapeDtypeStruct((3 * H, B, S, Dh), cdt),
        grid=(3 * H, B, S // tm_in, D // tk_in),
        in_specs=[
            pl.BlockSpec((1, tm_in, tk_in), lambda ph, b, i, k: (b, i, k)),
            pl.BlockSpec((1, tk_in, Dh), lambda ph, b, i, k: (ph, k, 0)),
            pl.BlockSpec((1, 1, Dh), lambda ph, b, i, k: (ph, 0, 0)),
        ],
        out_specs=pl.BlockSpec((1, 1, tm_in, Dh),
                               lambda ph, b, i, k: (ph, b, i, 0)),
        scratch_shapes=[pltpu.VMEM((tm_in, Dh), jnp.float32)],
        compiler_params=pltpu.CompilerParams(
            dimension_semantics=("parallel", "parallel", "parallel",
                                 "arbitrary"),
            vmem_limit_bytes=vmem_limit),
    )(x, params["w_qkv"], params["b_qkv"])

    # ---- Stage 2: flash attention, grid (B, H, q_tile, kv_tile) -------------
    if causal_mask:
        # Clamp kv block index to the diagonal tile for fully-masked tiles so
        # their k/v DMAs are elided (same block index as the previous step);
        # the compute itself is skipped inside the kernel via pl.when.
        def _kv_blk(i, j):
            return jnp.minimum(j, (i * tq + tq - 1) // tkv)
    else:
        def _kv_blk(i, j):
            return j

    attn = pl.pallas_call(
        functools.partial(_flash_attn_kernel, tq=tq, tkv=tkv,
                          causal=bool(causal_mask), compute_dtype=cdt,
                          approx_recip=bool(approx_softmax_recip)),
        out_shape=jax.ShapeDtypeStruct((B, H, S, Dh), cdt),
        grid=(B, H, S // tq, S // tkv),
        in_specs=[
            pl.BlockSpec((1, 1, tq, Dh),
                         lambda b, h, i, j: (h, b, i, 0)),                # q
            pl.BlockSpec((1, 1, tkv, Dh),
                         lambda b, h, i, j: (H + h, b, _kv_blk(i, j), 0)),  # k
            pl.BlockSpec((1, 1, tkv, Dh),
                         lambda b, h, i, j: (2 * H + h, b, _kv_blk(i, j), 0)),  # v
        ],
        out_specs=pl.BlockSpec((1, 1, tq, Dh),
                               lambda b, h, i, j: (b, h, i, 0)),
        scratch_shapes=[pltpu.VMEM((tq, 1), jnp.float32),     # running max m
                        pltpu.VMEM((tq, 1), jnp.float32),     # running sum l
                        pltpu.VMEM((tq, Dh), jnp.float32)],   # output acc
        compiler_params=pltpu.CompilerParams(
            dimension_semantics=("parallel", "parallel", "parallel",
                                 "arbitrary"),
            vmem_limit_bytes=vmem_limit),
    )(qkvh, qkvh, qkvh)

    # ---- Stage 3: out_proj ---------------------------------------------------
    # Reproduce torch's dropped transpose(1, 2): (B, H, S, Dh) is reshaped
    # DIRECTLY to (B*S, D) — a zero-copy row-major view.
    attn_flat = attn.reshape(M, D)

    y = pl.pallas_call(
        functools.partial(_matmul_bias_kernel, compute_dtype=cdt),
        out_shape=jax.ShapeDtypeStruct((M, D), x.dtype),
        grid=(M // tm_o, D // tn_o, D // tk_o),
        in_specs=[
            pl.BlockSpec((tm_o, tk_o), lambda i, j, k: (i, k)),
            pl.BlockSpec((tk_o, tn_o), lambda i, j, k: (k, j)),
            pl.BlockSpec((1, tn_o), lambda i, j, k: (0, j)),
        ],
        out_specs=pl.BlockSpec((tm_o, tn_o), lambda i, j, k: (i, j)),
        scratch_shapes=[pltpu.VMEM((tm_o, tn_o), jnp.float32)],
        compiler_params=pltpu.CompilerParams(
            dimension_semantics=("parallel", "parallel", "arbitrary"),
            vmem_limit_bytes=vmem_limit),
    )(attn_flat, params["w_out_t"], params["b_out"])

    return y.reshape(B, S, D)


# ----------------------------------------------------------------------------
# Pure-JAX reference (port of the PyTorch forward, incl. the dropped transpose)
# ----------------------------------------------------------------------------
def self_attention_ref(x, w_in, b_in, w_out, b_out, n_heads, causal_mask=False):
    B, S, D = x.shape
    dh = D // n_heads
    qkv = x @ w_in.T + b_in
    q, k, v = jnp.split(qkv, 3, axis=-1)
    q = q.reshape(B, S, n_heads, dh).transpose(0, 2, 1, 3)
    k = k.reshape(B, S, n_heads, dh).transpose(0, 2, 1, 3)
    v = v.reshape(B, S, n_heads, dh).transpose(0, 2, 1, 3)
    w = q @ jnp.swapaxes(k, -1, -2)
    if causal_mask:
        mask = jnp.triu(jnp.ones((S, S), dtype=bool), 1)
        w = jnp.where(mask, -jnp.inf, w)
    w = w / math.sqrt(dh)
    w = jax.nn.softmax(w, axis=-1)
    out = w @ v                                    # (B, H, S, Dh)
    out = out.reshape(B, S, D)                     # transpose(1,2) was discarded
    return out @ w_out.T + b_out


if __name__ == "__main__":
    B, S, D, H = 2, 8, 32, 4                       # batch, seq, d_embd, n_heads

    key = jax.random.PRNGKey(0)
    kx, kwi, kbi, kwo, kbo = jax.random.split(key, 5)

    x = jax.random.normal(kx, (B, S, D), dtype=jnp.float32)
    bound = 1.0 / math.sqrt(D)                      # torch Linear default init
    w_in = jax.random.uniform(kwi, (3 * D, D), jnp.float32, -bound, bound)
    b_in = jax.random.uniform(kbi, (3 * D,), jnp.float32, -bound, bound)
    w_out = jax.random.uniform(kwo, (D, D), jnp.float32, -bound, bound)
    b_out = jax.random.uniform(kbo, (D,), jnp.float32, -bound, bound)

    # f32 matmul-input path: strict parity with the reference.
    params_f32 = prepare_self_attention_params(w_in, b_in, w_out, b_out, H,
                                               compute_dtype=jnp.float32)
    for causal in (False, True):
        out = jax.block_until_ready(
            self_attention_pallas(x, params_f32, causal_mask=causal))
        ref = self_attention_ref(x, w_in, b_in, w_out, b_out, H,
                                 causal_mask=causal)
        assert out.shape == (B, S, D)
        assert jnp.allclose(out, ref, atol=5e-3, rtol=5e-3), \
            f"f32 mismatch (causal={causal})"

    # Default bf16 matmul-input / f32-accumulate path (v5e/v6e/v7x MXU-native).
    params_bf16 = prepare_self_attention_params(w_in, b_in, w_out, b_out, H)
    for causal in (False, True):
        out = jax.block_until_ready(
            self_attention_pallas(x, params_bf16, causal_mask=causal))
        ref = self_attention_ref(x, w_in, b_in, w_out, b_out, H,
                                 causal_mask=causal)
        assert jnp.allclose(out, ref, atol=1e-1, rtol=1e-1), \
            f"bf16 mismatch (causal={causal})"

    print("KERNEL_OK")
</pallas_src>

<mosaic_0001>
module attributes {stable_mosaic.version = 11 : i64} {
  func.func @_qkv_proj_kernel(%arg0: i32, %arg1: i32, %arg2: i32, %arg3: i32, %arg4: memref<1x8x32xf32, #tpu.memory_space<vmem>>, %arg5: memref<1x32x8xf32, #tpu.memory_space<vmem>>, %arg6: memref<1x1x8xf32, #tpu.memory_space<vmem>>, %arg7: memref<1x1x8x8xf32, #tpu.memory_space<vmem>>, %arg8: memref<8x8xf32, #tpu.memory_space<vmem>>) attributes {dimension_semantics = [#tpu.dimension_semantics<parallel>, #tpu.dimension_semantics<parallel>, #tpu.dimension_semantics<parallel>, #tpu.dimension_semantics<arbitrary>], iteration_bounds = array<i64: 12, 2, 1, 1>, scalar_prefetch = 0 : i64, scratch_operands = 1 : i64, tpu.core_type = #tpu.core_type<tc>, window_params = [{transform_indices = @transform_0, window_bounds = array<i64: 1, 8, 32>}, {transform_indices = @transform_1, window_bounds = array<i64: 1, 32, 8>}, {transform_indices = @transform_2, window_bounds = array<i64: 1, 1, 8>}, {transform_indices = @transform_3, window_bounds = array<i64: 1, 1, 8, 8>}]} {
    %c0_i32 = arith.constant 0 : i32
    %0 = arith.cmpi eq, %arg3, %c0_i32 : i32
    %1 = arith.extui %0 : i1 to i32
    %c0_i32_0 = arith.constant 0 : i32
    %2 = arith.cmpi ne, %1, %c0_i32_0 : i32
    scf.if %2 {
      %cst_12 = arith.constant 0.000000e+00 : f32
      %14 = vector.broadcast %cst_12 : f32 to vector<8x8xf32>
      %c0_13 = arith.constant 0 : index
      %c0_14 = arith.constant 0 : index
      %15 = vector.load %arg8[%c0_13, %c0_14] : memref<8x8xf32, #tpu.memory_space<vmem>>, vector<8x8xf32>
      tpu.vector_store %arg8[%c0_13, %c0_14], %14 {strides = array<i32>} : memref<8x8xf32, #tpu.memory_space<vmem>>, vector<8x8xf32>,
    } else {
    }
    %c0 = arith.constant 0 : index
    %c0_1 = arith.constant 0 : index
    %c0_2 = arith.constant 0 : index
    %3 = vector.load %arg4[%c0, %c0_1, %c0_2] : memref<1x8x32xf32, #tpu.memory_space<vmem>>, vector<1x8x32xf32>
    %4 = vector.shape_cast %3 : vector<1x8x32xf32> to vector<8x32xf32>
    %c0_3 = arith.constant 0 : index
    %c0_4 = arith.constant 0 : index
    %5 = vector.load %arg8[%c0_3, %c0_4] : memref<8x8xf32, #tpu.memory_space<vmem>>, vector<8x8xf32>
    %c0_5 = arith.constant 0 : index
    %c0_6 = arith.constant 0 : index
    %c0_7 = arith.constant 0 : index
    %6 = vector.load %arg5[%c0_5, %c0_6, %c0_7] : memref<1x32x8xf32, #tpu.memory_space<vmem>>, vector<1x32x8xf32>
    %7 = vector.shape_cast %6 : vector<1x32x8xf32> to vector<32x8xf32>
    %cst = arith.constant dense<0.000000e+00> : vector<8x8xf32>
    %8 = tpu.matmul %4, %7, %cst {dimension_numbers = #tpu.dot_dimension_numbers<[1], [0], [0], [1], [0, 0, 1, 1], [], []>} : vector<8x32xf32>, vector<32x8xf32>, vector<8x8xf32> -> vector<8x8xf32>
    %9 = arith.addf %5, %8 : vector<8x8xf32>
    %c0_8 = arith.constant 0 : index
    %c0_9 = arith.constant 0 : index
    %10 = vector.load %arg8[%c0_8, %c0_9] : memref<8x8xf32, #tpu.memory_space<vmem>>, vector<8x8xf32>
    tpu.vector_store %arg8[%c0_8, %c0_9], %9 {strides = array<i32>} : memref<8x8xf32, #tpu.memory_space<vmem>>, vector<8x8xf32>,
    %c0_i32_10 = arith.constant 0 : i32
    %11 = arith.cmpi eq, %arg3, %c0_i32_10 : i32
    %12 = arith.extui %11 : i1 to i32
    %c0_i32_11 = arith.constant 0 : i32
    %13 = arith.cmpi ne, %12, %c0_i32_11 : i32
    scf.if %13 {
      %c0_12 = arith.constant 0 : index
      %c0_13 = arith.constant 0 : index
      %14 = vector.load %arg8[%c0_12, %c0_13] : memref<8x8xf32, #tpu.memory_space<vmem>>, vector<8x8xf32>
      %c0_14 = arith.constant 0 : index
      %c0_15 = arith.constant 0 : index
      %c0_16 = arith.constant 0 : index
      %15 = vector.load %arg6[%c0_14, %c0_15, %c0_16] : memref<1x1x8xf32, #tpu.memory_space<vmem>>, vector<1x1x8xf32>
      %16 = vector.shape_cast %15 : vector<1x1x8xf32> to vector<1x8xf32>
      %17 = vector.broadcast %16 : vector<1x8xf32> to vector<8x8xf32>
      %18 = arith.addf %14, %17 : vector<8x8xf32>
      %c0_17 = arith.constant 0 : index
      %c0_18 = arith.constant 0 : index
      %c0_19 = arith.constant 0 : index
      %c0_20 = arith.constant 0 : index
      %19 = vector.load %arg7[%c0_17, %c0_18, %c0_19, %c0_20] : memref<1x1x8x8xf32, #tpu.memory_space<vmem>>, vector<1x1x8x8xf32>
      %20 = vector.shape_cast %19 : vector<1x1x8x8xf32> to vector<8x8xf32>
      %21 = vector.shape_cast %18 : vector<8x8xf32> to vector<1x1x8x8xf32>
      tpu.vector_store %arg7[%c0_17, %c0_18, %c0_19, %c0_20], %21 {strides = array<i32>} : memref<1x1x8x8xf32, #tpu.memory_space<vmem>>, vector<1x1x8x8xf32>,
    } else {
    }
    return
  }
  func.func @transform_0(%arg0: i32, %arg1: i32, %arg2: i32, %arg3: i32) -> (i32, i32, i32) {
    %c0_i32 = arith.constant 0 : i32
    return %arg1, %arg2, %arg3 : i32, i32, i32
  }
  func.func @transform_1(%arg0: i32, %arg1: i32, %arg2: i32, %arg3: i32) -> (i32, i32, i32) {
    %c0_i32 = arith.constant 0 : i32
    %c0_i32_0 = arith.constant 0 : i32
    return %arg0, %arg3, %c0_i32 : i32, i32, i32
  }
  func.func @transform_2(%arg0: i32, %arg1: i32, %arg2: i32, %arg3: i32) -> (i32, i32, i32) {
    %c0_i32 = arith.constant 0 : i32
    %c0_i32_0 = arith.constant 0 : i32
    %c0_i32_1 = arith.constant 0 : i32
    return %arg0, %c0_i32, %c0_i32_0 : i32, i32, i32
  }
  func.func @transform_3(%arg0: i32, %arg1: i32, %arg2: i32, %arg3: i32) -> (i32, i32, i32, i32) {
    %c0_i32 = arith.constant 0 : i32
    %c0_i32_0 = arith.constant 0 : i32
    return %arg0, %arg1, %arg2, %c0_i32 : i32, i32, i32, i32
  }
}

</mosaic_0001>

<bundles_post_ra>
// kernel: tpu_custom_call.1
= control target key start
LH: loop header
LB: loop body
LE: loop exit
PB: predicated region body
PF: predicated region fallthrough
CT: control target
= control target key end

     0   :  { %s656_s12 = smov 0   ;;  %s658_s13 = smov 0   ;;  %s716_s0 = inlined_call_operand.vmem [shape: f32[2,8,32], index: 0, kind: input, shape index: {}]   ;;  %s717_s1 = inlined_call_operand.vmem [shape: f32[12,32,8], index: 1, kind: input, shape index: {}]   ;;  %s718_s2 = inlined_call_operand.vmem [shape: f32[12,1,8], index: 2, kind: input, shape index: {}]   ;;  %s719_s3 = inlined_call_operand.vmem [shape: f32[12,2,8,8], index: 3, kind: output, shape index: {}]  }
   0x1   :  { %s660_s14 = smov 0   ;;  %s662_s15 = smov 0  }
   0x2   :  { %s664_s16 = smov 0  }
   0x3 LB: > { %s35_s17 = sadd.s32 1, %s623_s14  ;;  %s39_s18 = sadd.s32 1, %s627_s15  ;;  %s631_s16 = sphi %s664_s16, %s13_s16   ;;  %s627_s15 = sphi %s662_s15, %s723_s15   ;;  %s623_s14 = sphi %s660_s14, %s722_s14   ;;  %s619_s13 = sphi %s658_s13, %s721_s13   ;;  %s615_s12 = sphi %s656_s12, %s720_s12  }
   0x4   : > { %p37_p0 = scmp.ge.s32.totalorder %s35_s17, 2  ;;  %p517_p1 = scmp.ge.s32.totalorder %s631_s16, 1 }
   0x5   : > { %p201_p2 = scmp.lt.s32.totalorder %s631_s16, 25 }
   0x6   : > { %s725_s17 = smov (%p37_p0, %s35_s17), 0  ;;  %s727_s18 = smov (!%p37_p0, %s39_s18), %s627_s15 }
   0x7   : > { %p202_p3 = pnand %p517_p1, %p201_p2  ;;  %p41_p4 = scmp.ge.s32.totalorder %s727_s18, 12 }
   0x8   : > { %p259_p5 = scmp.lt.s32.totalorder (!%p202_p3), %s619_s13, 11  ;;  %vm286_vm0 = vcmask (!%p202_p3), 64512   ;;  %p248_p6 = scmp.lt.s32.totalorder (!%p202_p3), %s615_s12, 1  ;;  %v633_v0 = vmov (!%p202_p3), 0.0|0.0   ;;  %v634_v1 = vmov (!%p202_p3), 0.0   ;;  %vm635_vm1 = vmmov (!%p202_p3), 0  }
   0x9   : > { %s729_s18 = smov (%p41_p4, %s727_s18), 0  ;;  %205 = sbr.rel (%p202_p3) target bundleno = 254 (0xfe), region = 32 }
   0xa   : > { %544 = vmatprep.subr.bf16.mxu0 (!%p202_p3), %v633_v0  ;;  %287 = vst.msk [vmem:[#allocation2] sm:$0xff] (!%p202_p3), %vm286_vm0, %v634_v1  ;;  %541 = vmatprep.mubr.msk.f32.mxu0 (!%p202_p3), %vm635_vm1, %v634_v1  ;;  %vm294_vm2 = vcmask (!%p202_p3), 261120  }
  0x10   : > { %s731_s13 = smov (!%p259_p5, %s619_s13), 11  ;;  %s733_s12 = smov (!%p248_p6, %s615_s12), 1 }
  0x11   : > { %s527_s19 = sshll.u32 %s731_s13, 5  ;;  %s521_s23 = sshll.u32 %s731_s13, 1  ;;  %v289_v9 = vld [vmem:[#allocation2] sm:$0xff] }
  0x12   : > { %s266_s22 = scalar_lea.vmem %s717_s1, %s527_s19  ;;  %s518_s24 = sshll.u32 %s733_s12, 3 }
  0x13   : > { %v290_v2 = vld [vmem:[%s266_s22] sm:$0xff]  ;;  %v291_v3 = vld [vmem:[%s266_s22 + $0x8] sm:$0xff]  ;;  %v292_v4 = vld [vmem:[%s266_s22 + $0x10] sm:$0xff]  ;;  %s279_s25 = sadd.s32 %s521_s23, %s733_s12  ;;  %s257_s28 = scalar_lea.vmem %s716_s0, %s518_s24 }
  0x14   : > { %v545_v5 = vpack.c.bf16 %v291_v3, %v290_v2  ;;  %v293_v6 = vld [vmem:[%s266_s22 + $0x18] sm:$0xff]  ;;  %v288_v8 = vld [vmem:[%s257_s28] sm:$0xff]  ;;  %s270_s4 = scalar_lea.vmem %s718_s2, %s731_s13  ;;  %s522_s5 = sshll.u32 %s279_s25, 3 }
  0x15   : > { %v548_v7 = vpack.c.bf16 %v293_v6, %v292_v4  ;;  %v524_v13 = vld [vmem:[%s270_s4] ss:$0 sm:$0xff]  ;;  %s281_s8 = scalar_lea.vmem %s719_s3, %s522_s5 }
  0x16   : > { %546 = vmatpush3.bf16.msra.mxu0 %v545_v5 }
  0x17   : > { %547 = vmatprep.subr.bf16.mxu0 %v633_v0 }
  0x1a   : > { %549 = vmatpush3.bf16.msra.mxu0 %v548_v7 }
  0x1d   : > { %542 = vmatmul.mubr.msk.f32.vlgmr.msra.gmra.mrb[0].mxu0 %vm294_vm2, %v288_v8 }
  0xf0   : > { %v364_v10 = vpop.f32.mrb[0].mxu0 }
  0xf1   : > { %v368_v11 = vadd.f32 %v364_v10, %v289_v9  ;;  %v543_v12 = vpop.f32.mrb[1].mxu0 }
  0xf3   : > { %370 = vst.msk [vmem:[#allocation2] sm:$0xff] %vm286_vm0, %v368_v11 }
  0xfa   : > { %v374_v14 = vld [vmem:[#allocation2] sm:$0xff] }
  0xfb   : > { %v382_v15 = vadd.f32 %v524_v13, %v374_v14 }
  0xfd   : > { %383 = vst.msk [vmem:[%s281_s8] sm:$0xff] %vm286_vm0, %v382_v15 }
  0xfe PF: > { %s13_s16 = sadd.s32 1, %s631_s16   ;;  %s720_s12 = smov %s623_s14 }
  0xff   : > { %p10_p7 = scmp.ge.s32.totalorder %s13_s16, 26   ;;  %s721_s13 = smov %s627_s15 }
 0x100   : > { %s722_s14 = smov %s725_s17  ;;  %s723_s15 = smov %s729_s18 }
 0x101   :  { %12 = sbr.rel (!%p10_p7) target bundleno = 3 (0x3), region = 76 }

</bundles_post_ra>
